<compile_context>
chip_gen: v7x
topology: tpu7x:2x2x1
jax: 0.10.0
libtpu: 0.0.40
codegen_flags: <defaults>
</compile_context>

<pallas_src>
import functools

import jax
import jax.numpy as jnp
from jax.experimental import pallas as pl
from jax.experimental.pallas import tpu as pltpu


# ----------------------------------------------------------------------------
# Kernel
# ----------------------------------------------------------------------------
def _gem3d_kernel(p_ref, x_ref, o_ref, acc_ref, *, eps, s_total, ts, n_spatial,
                  mask_last):
    """Grid = (row_tiles, spatial_tiles); spatial axis is the reduction ('arbitrary').

    acc_ref : (tr, 128) f32 VMEM scratch of per-lane partial sums, resident across
              the spatial axis and re-initialised at j == 0 for every row tile.
    o_ref   : (tr, 1) output block, written only at the final spatial step.
    """
    j = pl.program_id(1)
    p = p_ref[0]                                   # learnable GeM exponent (SMEM)
    inv_s = 1.0 / s_total

    def powed(v):                                  # clamp(v, eps) ** p, computed in f32
        vc = jnp.maximum(v.astype(jnp.float32), eps)
        return jnp.exp(p * jnp.log(vc))            # EUP log/exp

    def write_out(total):                          # total: (tr, 1) sum over all of S
        mean = total * inv_s
        o_ref[...] = jnp.exp(jnp.log(mean) / p).astype(o_ref.dtype)

    if n_spatial == 1:
        # Single spatial tile (ts == S): one-shot, no accumulator, no masking needed.
        xp = powed(x_ref[...])
        write_out(jnp.sum(xp, axis=1, keepdims=True))
        return

    folds = ts // 128                              # ts is a multiple of 128 here

    def fold128(v):                                # (tr, ts) -> (tr, 128) per-lane sums
        part = v[:, 0:128]                         # 128-lane-aligned slices: pure vreg
        for m in range(1, folds):                  # selection + VPU adds, no XLU
            part = part + v[:, m * 128:(m + 1) * 128]
        return part

    @pl.when(j == 0)
    def _init():
        acc_ref[...] = jnp.zeros_like(acc_ref)

    xp = powed(x_ref[...])

    if mask_last:
        # Only the last spatial tile can contain out-of-bounds (garbage) lanes.
        @pl.when(j < n_spatial - 1)
        def _body():
            acc_ref[...] += fold128(xp)

        @pl.when(j == n_spatial - 1)
        def _body_last():
            col = (n_spatial - 1) * ts + jax.lax.broadcasted_iota(
                jnp.int32, xp.shape, 1)
            acc_ref[...] += fold128(jnp.where(col < s_total, xp, 0.0))
    else:
        acc_ref[...] += fold128(xp)

    @pl.when(j == n_spatial - 1)
    def _finalize():
        write_out(jnp.sum(acc_ref[...], axis=1, keepdims=True))


# ----------------------------------------------------------------------------
# Wrapper
# ----------------------------------------------------------------------------
def gem3d_pallas(x, p, eps=1e-6, *, _target_block_bytes=12 * 1024 * 1024):
    """x: (N, C, D, H, W)  ->  (N, C, 1, 1, 1).  p: scalar / (1,) learnable exponent."""
    N, C, D, H, W = x.shape
    S = D * H * W
    R = N * C
    itemsize = x.dtype.itemsize

    x2 = x.reshape(R, S)                           # contiguous NCDHW -> free reshape

    # ---- row tiling: multiple of the sublane quantum; >=2 tiles when possible so
    # both v7x TensorCores get work; capped so the VMEM budget goes to the lane axis.
    sub = 8 * max(1, 4 // itemsize)                # 8 (f32) / 16 (bf16) / 32 (int8)
    if R <= sub:
        tr = R                                     # full dim (no alignment needed)
    else:
        tr = min(256, max(sub, (R // 2) // sub * sub))
    n_rows = pl.cdiv(R, tr)
    # TODO(synk): when n_rows == 1 (tiny N*C) on v7x, split the spatial reduction into
    # two 'parallel' halves plus a tiny combine so the second TensorCore isn't idle.

    # ---- spatial tiling: prefer the whole of S as one block (contiguous DMA burst
    # per row block); otherwise the largest 128-multiple tile under the byte target
    # (per-lane fold count capped so the in-kernel unroll stays small).
    lane_budget = max(128, (_target_block_bytes // (tr * itemsize)) // 128 * 128)
    if S <= lane_budget:
        ts, n_spatial = S, 1
    else:
        ts = min(lane_budget, 128 * 128)           # <= 128 per-lane folds per step
        n_spatial = pl.cdiv(S, ts)
    mask_last = (n_spatial > 1) and (S % ts != 0)

    block_bytes = tr * ts * itemsize
    vmem_limit = int(min(48 * 2**20,               # stay inside v7x's 64 MiB physical
                         max(8 * 2**20,
                             2 * block_bytes + tr * 128 * 4 + 2 * 2**20)))

    p_arr = jnp.asarray(p, jnp.float32).reshape(1)

    kernel = functools.partial(
        _gem3d_kernel, eps=float(eps), s_total=S, ts=ts, n_spatial=n_spatial,
        mask_last=mask_last)

    out2d = pl.pallas_call(
        kernel,
        out_shape=jax.ShapeDtypeStruct((R, 1), x.dtype),
        grid_spec=pltpu.PrefetchScalarGridSpec(
            num_scalar_prefetch=0,
            grid=(n_rows, n_spatial),
            in_specs=[
                pl.BlockSpec(memory_space=pltpu.MemorySpace.SMEM),   # p (scalar)
                pl.BlockSpec((tr, ts), lambda i, j: (i, j)),         # x tiles
            ],
            out_specs=pl.BlockSpec((tr, 1), lambda i, j: (i, 0)),    # written at finalize
            scratch_shapes=[pltpu.VMEM((tr, 128), jnp.float32)],     # per-lane accumulator
        ),
        compiler_params=pltpu.CompilerParams(
            dimension_semantics=("parallel", "arbitrary"),
            vmem_limit_bytes=vmem_limit,
        ),
    )(p_arr, x2)

    return out2d.reshape(N, C, 1, 1, 1)


# ----------------------------------------------------------------------------
if __name__ == "__main__":
    key = jax.random.PRNGKey(0)
    k1, k2 = jax.random.split(key)
    eps = 1e-6
    p = jnp.ones((1,), jnp.float32) * 3.0          # GeM3D learnable p (init = 3)

    def ref_gem3d(x, p, eps):
        # Mirrors F.avg_pool3d(x.clamp(eps)**p, full_window)**(1/p).
        return jnp.mean(jnp.maximum(x, eps) ** p[0],
                        axis=(2, 3, 4), keepdims=True) ** (1.0 / p[0])

    # Test 1: aligned shape -> single-spatial-tile fast path (one contiguous DMA
    # burst per row block, grid (1, 1)).
    x1 = jax.random.normal(k1, (2, 4, 16, 16, 16), jnp.float32)
    o1 = jax.block_until_ready(gem3d_pallas(x1, p, eps))
    assert o1.shape == (2, 4, 1, 1, 1), o1.shape
    assert bool(jnp.all(jnp.isfinite(o1)))
    r1 = ref_gem3d(x1, p, eps)
    assert jnp.allclose(o1, r1, rtol=1e-4, atol=1e-6), float(jnp.max(jnp.abs(o1 - r1)))

    # Test 2: ragged rows & spatial dims with a tiny block target -> exercises the
    # multi-tile path: partial row tile, masked last spatial tile, (tr,128) accumulator.
    x2 = jax.random.normal(k2, (2, 5, 9, 11, 13), jnp.float32)
    o2 = jax.block_until_ready(gem3d_pallas(x2, p, eps, _target_block_bytes=8 * 1024))
    assert o2.shape == (2, 5, 1, 1, 1), o2.shape
    assert bool(jnp.all(jnp.isfinite(o2)))
    r2 = ref_gem3d(x2, p, eps)
    assert jnp.allclose(o2, r2, rtol=1e-4, atol=1e-6), float(jnp.max(jnp.abs(o2 - r2)))

    print("KERNEL_OK")
</pallas_src>

<mosaic_0001>
module attributes {stable_mosaic.version = 11 : i64} {
  func.func @_gem3d_kernel(%arg0: i32, %arg1: i32, %arg2: memref<1xf32, #tpu.memory_space<smem>>, %arg3: memref<8x4096xf32, #tpu.memory_space<vmem>>, %arg4: memref<8x1xf32, #tpu.memory_space<vmem>>, %arg5: memref<8x128xf32, #tpu.memory_space<vmem>>) attributes {dimension_semantics = [#tpu.dimension_semantics<parallel>, #tpu.dimension_semantics<arbitrary>], iteration_bounds = array<i64: 1, 1>, scalar_prefetch = 0 : i64, scratch_operands = 1 : i64, tpu.core_type = #tpu.core_type<tc>, window_params = [{transform_indices = @transform_0, window_bounds = array<i64: 1>}, {transform_indices = @transform_1, window_bounds = array<i64: 8, 4096>}, {transform_indices = @transform_2, window_bounds = array<i64: 8, 1>}]} {
    %c0 = arith.constant 0 : index
    %0 = memref.load %arg2[%c0] : memref<1xf32, #tpu.memory_space<smem>>
    %c0_0 = arith.constant 0 : index
    %c0_1 = arith.constant 0 : index
    %1 = vector.load %arg3[%c0_0, %c0_1] : memref<8x4096xf32, #tpu.memory_space<vmem>>, vector<8x4096xf32>
    %cst = arith.constant 9.99999997E-7 : f32
    %2 = vector.broadcast %cst : f32 to vector<8x4096xf32>
    %3 = arith.maximumf %1, %2 : vector<8x4096xf32>
    %4 = math.log %3 : vector<8x4096xf32>
    %5 = vector.broadcast %0 : f32 to vector<8x4096xf32>
    %6 = arith.mulf %5, %4 : vector<8x4096xf32>
    %7 = math.exp %6 : vector<8x4096xf32>
    %cst_2 = arith.constant dense<0.000000e+00> : vector<8xf32>
    %8 = vector.multi_reduction <add>, %7, %cst_2 [1] : vector<8x4096xf32> to vector<8xf32>
    %9 = vector.shape_cast %8 : vector<8xf32> to vector<8x1xf32>
    %cst_3 = arith.constant 2.44140625E-4 : f32
    %10 = vector.broadcast %cst_3 : f32 to vector<8x1xf32>
    %11 = arith.mulf %9, %10 : vector<8x1xf32>
    %12 = math.log %11 : vector<8x1xf32>
    %13 = vector.broadcast %0 : f32 to vector<8x1xf32>
    %14 = arith.divf %12, %13 : vector<8x1xf32>
    %15 = math.exp %14 : vector<8x1xf32>
    %c0_4 = arith.constant 0 : index
    %c0_5 = arith.constant 0 : index
    %16 = vector.load %arg4[%c0_4, %c0_5] : memref<8x1xf32, #tpu.memory_space<vmem>>, vector<8x1xf32>
    tpu.vector_store %arg4[%c0_4, %c0_5], %15 {strides = array<i32>} : memref<8x1xf32, #tpu.memory_space<vmem>>, vector<8x1xf32>,
    return
  }
  func.func @transform_0(%arg0: i32, %arg1: i32) -> i32 {
    %c0_i32 = arith.constant 0 : i32
    %c0_i32_0 = arith.constant 0 : i32
    return %c0_i32 : i32
  }
  func.func @transform_1(%arg0: i32, %arg1: i32) -> (i32, i32) {
    %c0_i32 = arith.constant 0 : i32
    return %arg0, %arg1 : i32, i32
  }
  func.func @transform_2(%arg0: i32, %arg1: i32) -> (i32, i32) {
    %c0_i32 = arith.constant 0 : i32
    %c0_i32_0 = arith.constant 0 : i32
    return %arg0, %c0_i32 : i32, i32
  }
}

</mosaic_0001>

<bundles_post_ra>
// kernel: tpu_custom_call.1
= control target key start
LH: loop header
LB: loop body
LE: loop exit
PB: predicated region body
PF: predicated region fallthrough
CT: control target
= control target key end

     0   :  { %8 = vsyncpa [#allocation5], 0  ;;  %s456_s9 = smov [#allocation4]   ;;  %s525_s0 = inlined_call_operand.<no memory space> [shape: f32[1], index: 0, kind: input, shape index: {}]   ;;  %s526_s1 = inlined_call_operand.hbm [shape: f32[8,4096], index: 1, kind: input, shape index: {}]   ;;  %s527_s2 = inlined_call_operand.vmem [shape: f32[8,1], index: 2, kind: output, shape index: {}]  }
   0x1   :  { %s17_s10 = sshll.u32 %s456_s9, 4  ;;  %s432_s13 = scalar_lea.hbm %s526_s1, 4096  ;;  %s18_s10 = int_to_ptr.vmem [resolvable:$true] %s17_s10 }
   0x2   :  { %p433_p0 = scmp.ne.s32.totalorder %s526_s1, %s432_s13  ;;  %p436_p1 = scmp.lt.u32.totalorder %s432_s13, %s526_s1 }
   0x4   :  { %p438_p2 = pnand %p436_p1, %p433_p0 }
   0x6   :  { %441 = shalt.err (!%p438_p2)
}
   0x7   :  { %s442_s18 = scalar_lea.vmem %s18_s10, 4096  ;;  %p447_p4 = scmp.lt.s32.totalorder %s18_s10, %s18_s10 }
   0x8   :  { %p443_p3 = scmp.ne.s32.totalorder %s18_s10, %s442_s18  ;;  %p448_p5 = scmp.lt.s32.totalorder %s442_s18, %s442_s18 }
   0xa   :  { %p449_p6 = por %p448_p5, %p447_p4 }
   0xc   :  { %p450_p7 = pnand %p449_p6, %p443_p3 }
   0xe   :  { %453 = shalt.err (!%p450_p7)
}
   0xf   :  { %20 = dma.hbm_to_vmem [thread:$0]  %s526_s1, 4096, %s18_s10, [#allocation5]  }
  0x10   :  { %454 = dma.done.wait [#allocation5], 4096  }
  0x11   :  { %455 = vsyncadd [#allocation5], 4294963200  ;;  %v25_v0 = vld [vmem:[#allocation4] sm:$0xff]  ;;  %v26_v1 = vld [vmem:[#allocation4 + $0x8] sm:$0xff]  ;;  %v487_v27 = vstv %s525_s0  ;;  %vm290_vm0 = vcmask 7168  }
  0x12   :  { %v27_v2 = vld [vmem:[#allocation4 + $0x10] sm:$0xff]  ;;  %v57_v3 = vmax.f32 %v25_v0, 1e-06  ;;  %v58_v4 = vmax.f32 %v26_v1, 1e-06  ;;  %v28_v5 = vld [vmem:[#allocation4 + $0x18] sm:$0xff] }
  0x13   :  { %v59_v6 = vmax.f32 %v27_v2, 1e-06  ;;  %v29_v7 = vld [vmem:[#allocation4 + $0x20] sm:$0xff]  ;;  %v60_v8 = vmax.f32 %v28_v5, 1e-06  ;;  %v30_v9 = vld [vmem:[#allocation4 + $0x28] sm:$0xff] }
  0x14   :  { %298 = vlog2.f32 %v57_v3  ;;  %v61_v10 = vmax.f32 %v29_v7, 1e-06  ;;  %v31_v11 = vld [vmem:[#allocation4 + $0x30] sm:$0xff]  ;;  %v62_v12 = vmax.f32 %v30_v9, 1e-06  ;;  %v32_v13 = vld [vmem:[#allocation4 + $0x38] sm:$0xff] }
  0x15   :  { %300 = vlog2.f32 %v58_v4  ;;  %v63_v14 = vmax.f32 %v31_v11, 1e-06  ;;  %v33_v15 = vld [vmem:[#allocation4 + $0x40] sm:$0xff]  ;;  %v64_v16 = vmax.f32 %v32_v13, 1e-06  ;;  %v34_v18 = vld [vmem:[#allocation4 + $0x48] sm:$0xff] }
  0x16   :  { %302 = vlog2.f32 %v59_v6  ;;  %v65_v20 = vmax.f32 %v33_v15, 1e-06  ;;  %v35_v21 = vld [vmem:[#allocation4 + $0x50] sm:$0xff]  ;;  %v66_v23 = vmax.f32 %v34_v18, 1e-06  ;;  %v36_v25 = vld [vmem:[#allocation4 + $0x58] sm:$0xff] }
  0x17   :  { %304 = vlog2.f32 %v60_v8  ;;  %v67_v29 = vmax.f32 %v35_v21, 1e-06  ;;  %v37_v30 = vld [vmem:[#allocation4 + $0x60] sm:$0xff]  ;;  %v38_v33 = vld [vmem:[#allocation4 + $0x68] sm:$0xff]  ;;  %v68_v34 = vmax.f32 %v36_v25, 1e-06 }
  0x18   :  { %306 = vlog2.f32 %v61_v10  ;;  %v69_v39 = vmax.f32 %v37_v30, 1e-06  ;;  %v39_v40 = vld [vmem:[#allocation4 + $0x70] sm:$0xff]  ;;  %v70_v41 = vmax.f32 %v38_v33, 1e-06  ;;  %v40_v46 = vld [vmem:[#allocation4 + $0x78] sm:$0xff] }
  0x19   :  { %308 = vlog2.f32 %v62_v12  ;;  %v71_v51 = vmax.f32 %v39_v40, 1e-06  ;;  %v41_v52 = vld [vmem:[#allocation4 + $0x80] sm:$0xff]  ;;  %v72_v57 = vmax.f32 %v40_v46, 1e-06  ;;  %v42_v58 = vld [vmem:[#allocation4 + $0x88] sm:$0xff] }
  0x1a   :  { %310 = vlog2.f32 %v63_v14  ;;  %v73_v63 = vmax.f32 %v41_v52, 1e-06  ;;  %v43_v0 = vld [vmem:[#allocation4 + $0x90] sm:$0xff]  ;;  %v74_v5 = vmax.f32 %v42_v58, 1e-06  ;;  %v44_v6 = vld [vmem:[#allocation4 + $0x98] sm:$0xff] }
  0x1b   :  { %312 = vlog2.f32 %v64_v16  ;;  %v75_v11 = vmax.f32 %v43_v0, 1e-06  ;;  %v45_v12 = vld [vmem:[#allocation4 + $0xa0] sm:$0xff]  ;;  %v51_v58 = vld [vmem:[#allocation4 + $0xd0] sm:$0xff] }
  0x1c   :  { %314 = vlog2.f32 %v65_v20 }
  0x1d   :  { %316 = vlog2.f32 %v66_v23 }
  0x1e   :  { %v299_v17 = vpop.eup %298  ;;  %318 = vlog2.f32 %v67_v29 }
  0x1f   :  { %v301_v19 = vpop.eup %300  ;;  %v90_v24 = vmul.f32 0.6931472, %v299_v17  ;;  %320 = vlog2.f32 %v68_v34  ;;  %v76_v17 = vmax.f32 %v44_v6, 1e-06  ;;  %v48_v34 = vld [vmem:[#allocation4 + $0xb8] sm:$0xff] }
  0x20   :  { %v303_v22 = vpop.eup %302  ;;  %v92_v26 = vmul.f32 0.6931472, %v301_v19  ;;  %322 = vlog2.f32 %v69_v39  ;;  %v46_v19 = vld [vmem:[#allocation4 + $0xa8] sm:$0xff] }
  0x21   :  { %v305_v28 = vpop.eup %304  ;;  %v94_v31 = vmul.f32 0.6931472, %v303_v22  ;;  %v154_v35 = vmul.f32 %v487_v27, %v90_v24  ;;  %324 = vlog2.f32 %v70_v41  ;;  %v77_v24 = vmax.f32 %v45_v12, 1e-06 }
  0x22   :  { %v307_v32 = vpop.eup %306  ;;  %v96_v36 = vmul.f32 0.6931472, %v305_v28  ;;  %v155_v37 = vmul.f32 %v487_v27, %v92_v26  ;;  %v47_v26 = vld [vmem:[#allocation4 + $0xb0] sm:$0xff] }
  0x23   :  { %v309_v38 = vpop.eup %308  ;;  %v98_v42 = vmul.f32 0.6931472, %v307_v32  ;;  %v156_v43 = vmul.f32 %v487_v27, %v94_v31  ;;  %v186_v45 = vmul.f32 1.442695, %v154_v35  ;;  %v78_v32 = vmax.f32 %v46_v19, 1e-06 }
  0x24   :  { %v311_v44 = vpop.eup %310  ;;  %v100_v47 = vmul.f32 0.6931472, %v309_v38  ;;  %v157_v48 = vmul.f32 %v487_v27, %v96_v36  ;;  %v188_v49 = vmul.f32 1.442695, %v155_v37  ;;  %v79_v39 = vmax.f32 %v47_v26, 1e-06 }
  0x25   :  { %v313_v50 = vpop.eup %312  ;;  %v102_v53 = vmul.f32 0.6931472, %v311_v44  ;;  %v158_v54 = vmul.f32 %v487_v27, %v98_v42  ;;  %v190_v55 = vmul.f32 1.442695, %v156_v43  ;;  %326 = vpow2.f32 %v186_v45  ;;  %v49_v42 = vld [vmem:[#allocation4 + $0xc0] sm:$0xff]  ;;  %v55_v26 = vld [vmem:[#allocation4 + $0xf0] sm:$0xff] }
  0x26   :  { %v315_v56 = vpop.eup %314  ;;  %v104_v59 = vmul.f32 0.6931472, %v313_v50  ;;  %v159_v60 = vmul.f32 %v487_v27, %v100_v47  ;;  %328 = vpow2.f32 %v188_v49  ;;  %v192_v61 = vmul.f32 1.442695, %v157_v48  ;;  %v50_v50 = vld [vmem:[#allocation4 + $0xc8] sm:$0xff] }
  0x27   :  { %v317_v62 = vpop.eup %316  ;;  %330 = vlog2.f32 %v71_v51  ;;  %v106_v1 = vmul.f32 0.6931472, %v315_v56  ;;  %v160_v2 = vmul.f32 %v487_v27, %v102_v53  ;;  %v194_v3 = vmul.f32 1.442695, %v158_v54 }
  0x28   :  { %332 = vpow2.f32 %v190_v55  ;;  %v319_v4 = vpop.eup %318  ;;  %v108_v7 = vmul.f32 0.6931472, %v317_v62  ;;  %v161_v8 = vmul.f32 %v487_v27, %v104_v59  ;;  %v196_v9 = vmul.f32 1.442695, %v159_v60 }
  0x29   :  { %334 = vlog2.f32 %v72_v57  ;;  %v321_v10 = vpop.eup %320  ;;  %v110_v13 = vmul.f32 0.6931472, %v319_v4  ;;  %v162_v14 = vmul.f32 %v487_v27, %v106_v1  ;;  %v198_v15 = vmul.f32 1.442695, %v160_v2  ;;  %v52_v2 = vld [vmem:[#allocation4 + $0xd8] sm:$0xff] }
  0x2a   :  { %336 = vpow2.f32 %v192_v61  ;;  %v323_v16 = vpop.eup %322  ;;  %v112_v20 = vmul.f32 0.6931472, %v321_v10  ;;  %v163_v21 = vmul.f32 %v487_v27, %v108_v7  ;;  %v200_v22 = vmul.f32 1.442695, %v161_v8  ;;  %v53_v10 = vld [vmem:[#allocation4 + $0xe0] sm:$0xff] }
  0x2b   :  { %338 = vlog2.f32 %v73_v63  ;;  %v325_v18 = vpop.eup %324  ;;  %v114_v28 = vmul.f32 0.6931472, %v323_v16  ;;  %v164_v29 = vmul.f32 %v487_v27, %v110_v13  ;;  %v202_v30 = vmul.f32 1.442695, %v162_v14 }
  0x2c   :  { %340 = vpow2.f32 %v194_v3  ;;  %v116_v35 = vmul.f32 0.6931472, %v325_v18  ;;  %v165_v36 = vmul.f32 %v487_v27, %v112_v20  ;;  %v204_v37 = vmul.f32 1.442695, %v163_v21  ;;  %v54_v18 = vld [vmem:[#allocation4 + $0xe8] sm:$0xff] }
  0x2d   :  { %342 = vlog2.f32 %v74_v5  ;;  %v166_v44 = vmul.f32 %v487_v27, %v114_v28  ;;  %v206_v45 = vmul.f32 1.442695, %v164_v29  ;;  %v80_v47 = vmax.f32 %v48_v34, 1e-06 }
  0x2e   :  { %344 = vpow2.f32 %v196_v9  ;;  %v167_v52 = vmul.f32 %v487_v27, %v116_v35  ;;  %v208_v53 = vmul.f32 1.442695, %v165_v36  ;;  %v81_v55 = vmax.f32 %v49_v42, 1e-06  ;;  %v56_v35 = vld [vmem:[#allocation4 + $0xf8] sm:$0xff] }
  0x2f   :  { %v327_v23 = vpop.eup %326  ;;  %346 = vlog2.f32 %v75_v11  ;;  %v210_v61 = vmul.f32 1.442695, %v166_v44  ;;  %v82_v63 = vmax.f32 %v50_v50, 1e-06  ;;  %v83_v7 = vmax.f32 %v51_v58, 1e-06 }
  0x30   :  { %v329_v25 = vpop.eup %328  ;;  %348 = vpow2.f32 %v198_v15  ;;  %v212_v5 = vmul.f32 1.442695, %v167_v52  ;;  %v84_v15 = vmax.f32 %v52_v2, 1e-06 }
  0x31   :  { %v331_v31 = vpop.eup %330  ;;  %350 = vlog2.f32 %v76_v17  ;;  %v250_v40 = vadd.f32 %v329_v25, %v327_v23  ;;  %v85_v23 = vmax.f32 %v53_v10, 1e-06 }
  0x32   :  { %v333_v33 = vpop.eup %332  ;;  %352 = vpow2.f32 %v200_v22  ;;  %v118_v43 = vmul.f32 0.6931472, %v331_v31 }
  0x33   :  { %v335_v38 = vpop.eup %334  ;;  %354 = vlog2.f32 %v77_v24  ;;  %v251_v48 = vadd.f32 %v333_v33, %v250_v40  ;;  %v87_v40 = vmax.f32 %v55_v26, 1e-06 }
  0x34   :  { %v337_v41 = vpop.eup %336  ;;  %356 = vpow2.f32 %v202_v30  ;;  %v120_v51 = vmul.f32 0.6931472, %v335_v38  ;;  %v168_v60 = vmul.f32 %v487_v27, %v118_v43 }
  0x35   :  { %v339_v46 = vpop.eup %338  ;;  %358 = vlog2.f32 %v78_v32  ;;  %v252_v56 = vadd.f32 %v337_v41, %v251_v48  ;;  %v86_v32 = vmax.f32 %v54_v18, 1e-06 }
  0x36   :  { %v341_v49 = vpop.eup %340  ;;  %360 = vpow2.f32 %v204_v37  ;;  %v122_v59 = vmul.f32 0.6931472, %v339_v46  ;;  %v169_v4 = vmul.f32 %v487_v27, %v120_v51  ;;  %v214_v13 = vmul.f32 1.442695, %v168_v60 }
  0x37   :  { %v343_v54 = vpop.eup %342  ;;  %362 = vlog2.f32 %v79_v39  ;;  %v253_v0 = vadd.f32 %v341_v49, %v252_v56 }
  0x38   :  { %v345_v57 = vpop.eup %344  ;;  %364 = vpow2.f32 %v206_v45  ;;  %v124_v3 = vmul.f32 0.6931472, %v343_v54  ;;  %v170_v12 = vmul.f32 %v487_v27, %v122_v59  ;;  %v216_v21 = vmul.f32 1.442695, %v169_v4 }
  0x39   :  { %v347_v62 = vpop.eup %346  ;;  %366 = vlog2.f32 %v80_v47  ;;  %v254_v8 = vadd.f32 %v345_v57, %v253_v0  ;;  %v88_v47 = vmax.f32 %v56_v35, 1e-06 }
  0x3a   :  { %v349_v1 = vpop.eup %348  ;;  %368 = vpow2.f32 %v208_v53  ;;  %v126_v11 = vmul.f32 0.6931472, %v347_v62  ;;  %v171_v20 = vmul.f32 %v487_v27, %v124_v3  ;;  %v218_v30 = vmul.f32 1.442695, %v170_v12 }
  0x3b   :  { %v351_v6 = vpop.eup %350  ;;  %370 = vlog2.f32 %v81_v55  ;;  %v255_v16 = vadd.f32 %v349_v1, %v254_v8 }
  0x3c   :  { %v353_v9 = vpop.eup %352  ;;  %372 = vpow2.f32 %v210_v61  ;;  %v128_v19 = vmul.f32 0.6931472, %v351_v6  ;;  %v172_v29 = vmul.f32 %v487_v27, %v126_v11  ;;  %v220_v38 = vmul.f32 1.442695, %v171_v20 }
  0x3d   :  { %v355_v14 = vpop.eup %354  ;;  %374 = vlog2.f32 %v82_v63  ;;  %v256_v24 = vadd.f32 %v353_v9, %v255_v16 }
  0x3e   :  { %v357_v17 = vpop.eup %356  ;;  %376 = vpow2.f32 %v212_v5  ;;  %v130_v28 = vmul.f32 0.6931472, %v355_v14  ;;  %v173_v37 = vmul.f32 %v487_v27, %v128_v19  ;;  %v222_v45 = vmul.f32 1.442695, %v172_v29 }
  0x3f   :  { %v359_v22 = vpop.eup %358  ;;  %378 = vlog2.f32 %v83_v7  ;;  %v257_v33 = vadd.f32 %v357_v17, %v256_v24 }
  0x40   :  { %v361_v25 = vpop.eup %360  ;;  %380 = vpow2.f32 %v214_v13  ;;  %v132_v36 = vmul.f32 0.6931472, %v359_v22  ;;  %v174_v44 = vmul.f32 %v487_v27, %v130_v28  ;;  %v224_v52 = vmul.f32 1.442695, %v173_v37 }
  0x41   :  { %v363_v31 = vpop.eup %362  ;;  %382 = vlog2.f32 %v84_v15  ;;  %v258_v41 = vadd.f32 %v361_v25, %v257_v33 }
  0x42   :  { %v365_v34 = vpop.eup %364  ;;  %384 = vpow2.f32 %v216_v21  ;;  %v134_v43 = vmul.f32 0.6931472, %v363_v31  ;;  %v175_v51 = vmul.f32 %v487_v27, %v132_v36  ;;  %v226_v58 = vmul.f32 1.442695, %v174_v44 }
  0x43   :  { %v367_v39 = vpop.eup %366  ;;  %386 = vlog2.f32 %v85_v23  ;;  %v259_v48 = vadd.f32 %v365_v34, %v258_v41 }
  0x44   :  { %v369_v42 = vpop.eup %368  ;;  %388 = vpow2.f32 %v218_v30  ;;  %v136_v50 = vmul.f32 0.6931472, %v367_v39  ;;  %v176_v57 = vmul.f32 %v487_v27, %v134_v43  ;;  %v228_v0 = vmul.f32 1.442695, %v175_v51 }
  0x45   :  { %v371_v46 = vpop.eup %370  ;;  %390 = vlog2.f32 %v86_v32  ;;  %v260_v54 = vadd.f32 %v369_v42, %v259_v48 }
  0x46   :  { %v373_v49 = vpop.eup %372  ;;  %392 = vpow2.f32 %v220_v38  ;;  %v138_v56 = vmul.f32 0.6931472, %v371_v46  ;;  %v177_v63 = vmul.f32 %v487_v27, %v136_v50  ;;  %v230_v6 = vmul.f32 1.442695, %v176_v57 }
  0x47   :  { %v375_v53 = vpop.eup %374  ;;  %394 = vlog2.f32 %v87_v40  ;;  %v261_v60 = vadd.f32 %v373_v49, %v260_v54 }
  0x48   :  { %v377_v55 = vpop.eup %376  ;;  %396 = vpow2.f32 %v222_v45  ;;  %v140_v62 = vmul.f32 0.6931472, %v375_v53  ;;  %v178_v5 = vmul.f32 %v487_v27, %v138_v56  ;;  %v232_v12 = vmul.f32 1.442695, %v177_v63 }
  0x49   :  { %v379_v59 = vpop.eup %378  ;;  %398 = vlog2.f32 %v88_v47  ;;  %v262_v2 = vadd.f32 %v377_v55, %v261_v60 }
  0x4a   :  { %v381_v61 = vpop.eup %380  ;;  %400 = vpow2.f32 %v224_v52  ;;  %v142_v4 = vmul.f32 0.6931472, %v379_v59  ;;  %v179_v11 = vmul.f32 %v487_v27, %v140_v62  ;;  %v234_v18 = vmul.f32 1.442695, %v178_v5 }
  0x4b   :  { %v383_v1 = vpop.eup %382  ;;  %402 = vpow2.f32 %v226_v58  ;;  %v263_v8 = vadd.f32 %v381_v61, %v262_v2 }
  0x4c   :  { %v385_v3 = vpop.eup %384  ;;  %v144_v10 = vmul.f32 0.6931472, %v383_v1  ;;  %404 = vpow2.f32 %v228_v0  ;;  %v180_v17 = vmul.f32 %v487_v27, %v142_v4  ;;  %v236_v24 = vmul.f32 1.442695, %v179_v11 }
  0x4d   :  { %v387_v7 = vpop.eup %386  ;;  %v264_v14 = vadd.f32 %v385_v3, %v263_v8  ;;  %406 = vpow2.f32 %v230_v6 }
  0x4e   :  { %v389_v9 = vpop.eup %388  ;;  %v146_v16 = vmul.f32 0.6931472, %v387_v7  ;;  %v181_v23 = vmul.f32 %v487_v27, %v144_v10  ;;  %408 = vpow2.f32 %v232_v12  ;;  %v238_v31 = vmul.f32 1.442695, %v180_v17 }
  0x4f   :  { %v391_v13 = vpop.eup %390  ;;  %v265_v20 = vadd.f32 %v389_v9, %v264_v14  ;;  %410 = vpow2.f32 %v234_v18 }
  0x50   :  { %v393_v15 = vpop.eup %392  ;;  %v148_v22 = vmul.f32 0.6931472, %v391_v13  ;;  %v182_v30 = vmul.f32 %v487_v27, %v146_v16  ;;  %412 = vpow2.f32 %v236_v24  ;;  %v240_v36 = vmul.f32 1.442695, %v181_v23 }
  0x51   :  { %v395_v19 = vpop.eup %394  ;;  %v266_v26 = vadd.f32 %v393_v15, %v265_v20  ;;  %414 = vpow2.f32 %v238_v31 }
  0x52   :  { %v397_v21 = vpop.eup %396  ;;  %v150_v29 = vmul.f32 0.6931472, %v395_v19  ;;  %v183_v35 = vmul.f32 %v487_v27, %v148_v22  ;;  %v242_v40 = vmul.f32 1.442695, %v182_v30  ;;  %416 = vpow2.f32 %v240_v36 }
  0x53   :  { %v399_v25 = vpop.eup %398  ;;  %v267_v32 = vadd.f32 %v397_v21, %v266_v26 }
  0x54   :  { %v401_v28 = vpop.eup %400  ;;  %v152_v34 = vmul.f32 0.6931472, %v399_v25  ;;  %v184_v39 = vmul.f32 %v487_v27, %v150_v29  ;;  %v244_v44 = vmul.f32 1.442695, %v183_v35  ;;  %418 = vpow2.f32 %v242_v40 }
  0x55   :  { %v403_v33 = vpop.eup %402  ;;  %v268_v37 = vadd.f32 %v401_v28, %v267_v32 }
  0x56   :  { %v405_v38 = vpop.eup %404  ;;  %v185_v43 = vmul.f32 %v487_v27, %v152_v34  ;;  %v246_v47 = vmul.f32 1.442695, %v184_v39  ;;  %420 = vpow2.f32 %v244_v44 }
  0x57   :  { %v269_v41 = vadd.f32 %v403_v33, %v268_v37  ;;  %v407_v42 = vpop.eup %406 }
  0x58   :  { %v409_v46 = vpop.eup %408  ;;  %v248_v50 = vmul.f32 1.442695, %v185_v43  ;;  %422 = vpow2.f32 %v246_v47 }
  0x59   :  { %v270_v45 = vadd.f32 %v405_v38, %v269_v41  ;;  %v411_v49 = vpop.eup %410 }
  0x5a   :  { %v413_v52 = vpop.eup %412  ;;  %424 = vpow2.f32 %v248_v50 }
  0x5b   :  { %v271_v48 = vadd.f32 %v407_v42, %v270_v45  ;;  %v415_v54 = vpop.eup %414  ;;  %426 = vrcp.f32 %v487_v27 }
  0x5c   :  { %v417_v56 = vpop.eup %416 }
  0x5d   :  { %v272_v51 = vadd.f32 %v409_v46, %v271_v48 }
  0x5e   :  { %v419_v58 = vpop.eup %418 }
  0x5f   :  { %v273_v53 = vadd.f32 %v411_v49, %v272_v51 }
  0x60   :  { %v421_v60 = vpop.eup %420 }
  0x61   :  { %v274_v55 = vadd.f32 %v413_v52, %v273_v53 }
  0x62   :  { %v423_v62 = vpop.eup %422 }
  0x63   :  { %v275_v57 = vadd.f32 %v415_v54, %v274_v55 }
  0x64   :  { %v425_v0 = vpop.eup %424 }
  0x65   :  { %v276_v59 = vadd.f32 %v417_v56, %v275_v57  ;;  %v427_v5 = vpop.eup %426 }
  0x67   :  { %v277_v61 = vadd.f32 %v419_v58, %v276_v59 }
  0x69   :  { %v278_v63 = vadd.f32 %v421_v60, %v277_v61 }
  0x6b   :  { %v279_v1 = vadd.f32 %v423_v62, %v278_v63 }
  0x6d   :  { %v280_v2 = vadd.f32 %v425_v0, %v279_v1 }
  0x6f   :  { %281 = vadd.xlane.f32.xlu0 %v280_v2 }
  0xfc   :  { %v282_v3 = vpop.xlane.xlu0 %281 }
  0xfd   :  { %v283_v4 = vmul.f32 0.00024414063, %v282_v3 }
  0xff   :  { %428 = vlog2.f32 %v283_v4 }
 0x109   :  { %v429_v6 = vpop.eup %428 }
 0x10a   :  { %v285_v7 = vmul.f32 0.6931472, %v429_v6 }
 0x10c   :  { %v287_v8 = vmul.f32 %v427_v5, %v285_v7 }
 0x10e   :  { %v288_v9 = vmul.f32 1.442695, %v287_v8 }
 0x110   :  { %430 = vpow2.f32 %v288_v9 }
 0x11a   :  { %v431_v10 = vpop.eup %430 }
 0x11b   :  { %291 = vst.msk [vmem:[%s527_s2] sm:$0xff] %vm290_vm0, %v431_v10 }
 0x11c   :  { %296 = vsyncpa [#allocation5], 1 }

</bundles_post_ra>
